<compile_context>
chip_gen: v7x
topology: tpu7x:2x2x1
jax: 0.10.0
libtpu: 0.0.40
codegen_flags: <defaults>
</compile_context>

<pallas_src>
import functools

import jax
import jax.numpy as jnp
from jax.experimental import pallas as pl
from jax.experimental.pallas import tpu as pltpu


# ---------------------------------------------------------------------------
# Positional-encoding table (parameter setup; built once, like __init__).
# ---------------------------------------------------------------------------
def make_sinusoid_table(max_len, d_model, dtype=jnp.float32):
    pos = jnp.arange(max_len, dtype=jnp.float32)[:, None]           # (L, 1)
    two_i = jnp.arange(0, d_model, 2, dtype=jnp.float32)[None, :]   # (1, D/2)
    angle = pos / jnp.power(10000.0, two_i / float(d_model))        # (L, D/2)
    table = jnp.zeros((max_len, d_model), dtype=jnp.float32)
    table = table.at[:, 0::2].set(jnp.sin(angle))
    table = table.at[:, 1::2].set(jnp.cos(angle))
    return table.astype(dtype)


# ---------------------------------------------------------------------------
# Kernel body.
#   seed_ref : SMEM (1,) int32     (scalar prefetch; only read in training mode)
#   x_ref    : VMEM (Bb, TS, 1)    raw values, broadcast along d_model
#   pos_ref  : VMEM (TS, D)        sinusoid tile (shared across the batch fold)
#   out_ref  : VMEM (Bb, TS, D)
# ---------------------------------------------------------------------------
def _embedding_kernel(seed_ref, x_ref, pos_ref, out_ref, *, drop_prob, training):
    # One broadcast-add per tile: (Bb, TS, 1) + (1, TS, D) -> (Bb, TS, D).
    y = x_ref[...] + pos_ref[...][None, :, :]

    if training and drop_prob > 0.0:
        if drop_prob >= 1.0:
            y = jnp.zeros_like(y)
        else:
            # Inverted dropout with the on-chip PRNG; independent stream/tile.
            s = pl.program_id(0)
            b = pl.program_id(1)
            # TODO(synk): per-tile seed = base + linear tile index; streams are
            # consecutive seeds, not provably independent (and != torch RNG).
            pltpu.prng_seed(seed_ref[0] + s * pl.num_programs(1) + b)
            bits = pltpu.prng_random_bits(y.shape)
            if bits.dtype != jnp.uint32:
                bits = pltpu.bitcast(bits, jnp.uint32)
            # uint32 compare avoids the int32 overflow at high drop_prob.
            thresh = jnp.uint32(min(int(float(drop_prob) * 2.0 ** 32),
                                    2 ** 32 - 1))
            scale = jnp.float32(1.0 / (1.0 - float(drop_prob)))
            y = jnp.where(bits >= thresh, y * scale, 0.0)

    out_ref[...] = y.astype(out_ref.dtype)


# ---------------------------------------------------------------------------
# Tile selection.
#   * TS is a multiple of the packed sublane height of the output dtype
#     (8 for f32, 16 for bf16, 32 for 1-byte) so stores stay unmasked.
#   * Bb is the largest divisor of B whose footprint still fits the budget.
#   * Footprint counts double-buffered out + pos tiles AND the lane-padded
#     (Bb, TS, 1) x column (padded to 128 lanes in VMEM).
#   * If TS does not divide S we rely on grid = cdiv(S, TS) (Pallas masks the
#     ragged last block) rather than ever using a whole-S fallback block.
# ---------------------------------------------------------------------------
def _choose_tiles(B, S, D, x_itemsize, out_itemsize, pos_itemsize,
                  vmem_budget_bytes=24 * 1024 * 1024, target_rows=2048):
    sub = max(8, 32 // max(1, int(out_itemsize)))   # packed sublane height

    def footprint(bb, ts):
        out_b = 2 * bb * ts * D * out_itemsize       # double-buffered output
        pos_b = 2 * ts * D * pos_itemsize            # double-buffered pos tile
        x_b = 2 * bb * ts * 128 * x_itemsize         # x column, lane-padded
        return out_b + pos_b + x_b

    # Row tile: full S if it is small and fits; otherwise the largest
    # multiple of `sub` (capped at target_rows) that fits with Bb = 1.
    if S <= target_rows and footprint(1, S) <= vmem_budget_bytes:
        ts = S
    else:
        ts = max(sub, (min(target_rows, S) // sub) * sub)
        while ts > sub and footprint(1, ts) > vmem_budget_bytes:
            ts -= sub

    # Batch fold: largest divisor of B that still fits the budget.
    bb = 1
    for cand in range(B, 0, -1):
        if B % cand == 0 and footprint(cand, ts) <= vmem_budget_bytes:
            bb = cand
            break

    return bb, ts, footprint(bb, ts)


# ---------------------------------------------------------------------------
# Wrapper: TransformerEmbedding.forward
# ---------------------------------------------------------------------------
def transformer_embedding(x, pos_table, *, drop_prob=0.0, training=False,
                          seed=0, out_dtype=None,
                          vmem_budget_bytes=24 * 1024 * 1024,
                          target_rows=2048):
    """out[b, s, d] = dropout(x[b, s] + pos_table[s, d])."""
    B, S = x.shape
    max_len, D = pos_table.shape
    assert S <= max_len, (S, max_len)

    # Default keeps the input dtype (exact PyTorch parity). Pass
    # out_dtype=jnp.bfloat16 to halve the dominant HBM write traffic; the pos
    # table is pre-cast to out_dtype so its read/VMEM footprint halves too.
    out_dtype = x.dtype if out_dtype is None else jnp.dtype(out_dtype)

    pos = pos_table[:S].astype(out_dtype)             # (S, D), like PositionalEncoding.forward
    x_col = x.reshape(B, S, 1)                        # column view for the d_model broadcast
    seed_arr = jnp.asarray([seed], dtype=jnp.int32)

    bb, ts, fp = _choose_tiles(
        B, S, D,
        x_itemsize=jnp.dtype(x.dtype).itemsize,
        out_itemsize=jnp.dtype(out_dtype).itemsize,
        pos_itemsize=jnp.dtype(out_dtype).itemsize,
        vmem_budget_bytes=vmem_budget_bytes,
        target_rows=target_rows)

    grid = (pl.cdiv(S, ts), B // bb)                  # batch-tile innermost -> pos reuse
    # Explicit scoped-VMEM limit so the chosen tiles are actually admitted
    # (safe headroom over the measured double-buffered footprint; well under
    # v7x's 64 MiB physical and v5e/v6e's 128 MiB).
    vmem_limit = int(max(32 * 1024 * 1024, fp + 8 * 1024 * 1024))

    kernel = functools.partial(_embedding_kernel,
                               drop_prob=float(drop_prob),
                               training=bool(training))

    return pl.pallas_call(
        kernel,
        out_shape=jax.ShapeDtypeStruct((B, S, D), out_dtype),
        grid_spec=pltpu.PrefetchScalarGridSpec(
            num_scalar_prefetch=1,                    # seed -> SMEM
            grid=grid,
            in_specs=[
                # x column: folded batch slab, amortized across Bb rows.
                pl.BlockSpec((bb, ts, 1), lambda s, b, *_: (b, s, 0)),
                # pos tile: block index constant across the inner batch axis.
                # (On v7x one could single-buffer this via pipeline_mode=
                #  pl.Buffered(1) to free VMEM; kept double-buffered here.)
                pl.BlockSpec((ts, D), lambda s, b, *_: (s, 0)),
            ],
            out_specs=pl.BlockSpec((bb, ts, D), lambda s, b, *_: (b, s, 0)),
        ),
        compiler_params=pltpu.CompilerParams(
            dimension_semantics=("parallel", "parallel"),
            vmem_limit_bytes=vmem_limit),
    )(seed_arr, x_col, pos)


# ---------------------------------------------------------------------------
# Demo / self-check.
# ---------------------------------------------------------------------------
if __name__ == "__main__":
    key = jax.random.PRNGKey(0)
    B, S, D, MAX_LEN = 2, 16, 128, 32

    x = jax.random.normal(key, (B, S), dtype=jnp.float32)
    pos_table = make_sinusoid_table(MAX_LEN, D)
    ref = x[:, :, None] + pos_table[:S][None, :, :]

    # 1) Eval-mode forward, f32 (dropout is identity, as in nn.Dropout().eval()).
    out = jax.block_until_ready(
        transformer_embedding(x, pos_table, drop_prob=0.1, training=False))
    assert out.shape == (B, S, D), out.shape
    assert jnp.allclose(out, ref, atol=1e-6, rtol=1e-6), "f32 kernel != reference"

    # 2) bf16 fast path (halved HBM write + pos traffic).
    out_bf16 = jax.block_until_ready(
        transformer_embedding(x, pos_table, drop_prob=0.1, training=False,
                              out_dtype=jnp.bfloat16))
    assert out_bf16.dtype == jnp.bfloat16
    assert jnp.allclose(out_bf16.astype(jnp.float32), ref, atol=5e-2, rtol=5e-2), \
        "bf16 kernel != reference"

    # 3) Ragged row-tile path: S not a multiple of the tile -> cdiv grid with a
    #    masked last block (exercised by shrinking target_rows).
    B2, S2 = 3, 40
    x2 = jax.random.normal(jax.random.PRNGKey(1), (B2, S2), dtype=jnp.float32)
    pos_table2 = make_sinusoid_table(64, D)
    out2 = jax.block_until_ready(
        transformer_embedding(x2, pos_table2, target_rows=16))
    ref2 = x2[:, :, None] + pos_table2[:S2][None, :, :]
    assert out2.shape == (B2, S2, D), out2.shape
    assert jnp.allclose(out2, ref2, atol=1e-6, rtol=1e-6), "ragged kernel != reference"

    print("KERNEL_OK")
</pallas_src>

<mosaic_0001>
module attributes {stable_mosaic.version = 11 : i64} {
  func.func @_embedding_kernel(%arg0: i32, %arg1: i32, %arg2: memref<1xi32, #tpu.memory_space<smem>>, %arg3: memref<2x16x1xf32, #tpu.memory_space<vmem>>, %arg4: memref<16x128xf32, #tpu.memory_space<vmem>>, %arg5: memref<2x16x128xf32, #tpu.memory_space<vmem>>) attributes {dimension_semantics = [#tpu.dimension_semantics<parallel>, #tpu.dimension_semantics<parallel>], iteration_bounds = array<i64: 1, 1>, scalar_prefetch = 1 : i64, scratch_operands = 0 : i64, tpu.core_type = #tpu.core_type<tc>, window_params = [{transform_indices = @transform_0, window_bounds = array<i64: 2, 16, 1>}, {transform_indices = @transform_1, window_bounds = array<i64: 16, 128>}, {transform_indices = @transform_2, window_bounds = array<i64: 2, 16, 128>}]} {
    %c0 = arith.constant 0 : index
    %c0_0 = arith.constant 0 : index
    %c0_1 = arith.constant 0 : index
    %0 = vector.load %arg3[%c0, %c0_0, %c0_1] : memref<2x16x1xf32, #tpu.memory_space<vmem>>, vector<2x16x1xf32>
    %c0_2 = arith.constant 0 : index
    %c0_3 = arith.constant 0 : index
    %1 = vector.load %arg4[%c0_2, %c0_3] : memref<16x128xf32, #tpu.memory_space<vmem>>, vector<16x128xf32>
    %2 = vector.shape_cast %1 : vector<16x128xf32> to vector<1x16x128xf32>
    %3 = vector.broadcast %0 : vector<2x16x1xf32> to vector<2x16x128xf32>
    %4 = vector.broadcast %2 : vector<1x16x128xf32> to vector<2x16x128xf32>
    %5 = arith.addf %3, %4 : vector<2x16x128xf32>
    %c0_4 = arith.constant 0 : index
    %c0_5 = arith.constant 0 : index
    %c0_6 = arith.constant 0 : index
    %6 = vector.load %arg5[%c0_4, %c0_5, %c0_6] : memref<2x16x128xf32, #tpu.memory_space<vmem>>, vector<2x16x128xf32>
    tpu.vector_store %arg5[%c0_4, %c0_5, %c0_6], %5 {strides = array<i32>} : memref<2x16x128xf32, #tpu.memory_space<vmem>>, vector<2x16x128xf32>,
    return
  }
  func.func @transform_0(%arg0: i32, %arg1: i32, %arg2: memref<1xi32, #tpu.memory_space<smem>>) -> (i32, i32, i32) {
    %c0_i32 = arith.constant 0 : i32
    %c0_i32_0 = arith.constant 0 : i32
    return %arg1, %arg0, %c0_i32 : i32, i32, i32
  }
  func.func @transform_1(%arg0: i32, %arg1: i32, %arg2: memref<1xi32, #tpu.memory_space<smem>>) -> (i32, i32) {
    %c0_i32 = arith.constant 0 : i32
    %c0_i32_0 = arith.constant 0 : i32
    return %arg0, %c0_i32 : i32, i32
  }
  func.func @transform_2(%arg0: i32, %arg1: i32, %arg2: memref<1xi32, #tpu.memory_space<smem>>) -> (i32, i32, i32) {
    %c0_i32 = arith.constant 0 : i32
    %c0_i32_0 = arith.constant 0 : i32
    return %arg1, %arg0, %c0_i32 : i32, i32, i32
  }
}

</mosaic_0001>

<bundles_post_ra>
// kernel: tpu_custom_call.1
= control target key start
LH: loop header
LB: loop body
LE: loop exit
PB: predicated region body
PF: predicated region fallthrough
CT: control target
= control target key end

     0   :  { %v94_v2 = vmov 0   ;;  %s148_s0 = inlined_call_operand.<no memory space> [shape: s32[1], index: 0, kind: input, shape index: {}]   ;;  %s149_s1 = inlined_call_operand.vmem [shape: f32[2,16,1], index: 1, kind: input, shape index: {}]   ;;  %s150_s2 = inlined_call_operand.vmem [shape: f32[16,128], index: 2, kind: input, shape index: {}]   ;;  %s151_s3 = inlined_call_operand.hbm [shape: f32[2,16,128], index: 3, kind: output, shape index: {}]  }
   0x1   :  { %v16_v0 = vld [vmem:[%s149_s1 + $0x10] sm:$0xff]  ;;  %v14_v1 = vld [vmem:[%s149_s1] sm:$0xff]  ;;  %69 = vset.pattern.permute.xlu1 %v94_v2  ;;  %68 = vset.pattern.permute.xlu0 %v94_v2 }
   0x2   :  { %9 = vsyncpa [#allocation5], 0  ;;  %32 = vperm.xlu1 %69, %v16_v0   ;;  %22 = vperm.xlu0 %68, %v14_v1   ;;  %v17_v3 = vld [vmem:[%s149_s1 + $0x18] sm:$0xff]  ;;  %v15_v4 = vld [vmem:[%s149_s1 + $0x8] sm:$0xff]  ;;  %s95_s21 = smov [#allocation4]  }
   0x3   :  { %v18_v5 = vld [vmem:[%s150_s2] sm:$0xff]  ;;  %s53_s22 = sshll.u32 %s95_s21, 4  ;;  %v19_v10 = vld [vmem:[%s150_s2 + $0x8] sm:$0xff]  ;;  %s54_s22 = int_to_ptr.vmem [resolvable:$true] %s53_s22 }
   0x4   :  { %s70_s1 = scalar_lea.vmem %s54_s22, 512  ;;  %p75_p1 = scmp.lt.s32.totalorder %s54_s22, %s54_s22 }
   0x5   :  { %p71_p0 = scmp.ne.s32.totalorder %s54_s22, %s70_s1  ;;  %p76_p2 = scmp.lt.s32.totalorder %s70_s1, %s70_s1 }
   0x6   :  { %37 = vperm.xlu1 %69, %v17_v3   ;;  %27 = vperm.xlu0 %68, %v15_v4  }
   0x7   :  { %p77_p3 = por %p76_p2, %p75_p1 }
   0x9   :  { %p78_p4 = pnand %p77_p3, %p71_p0 }
  0x81   :  { %v33_v6 = vpop.permute.xlu1 %32  ;;  %v23_v7 = vpop.permute.xlu0 %22 }
  0x82   :  { %v42_v8 = vadd.f32 %v33_v6, %v18_v5  ;;  %v40_v9 = vadd.f32 %v23_v7, %v18_v5 }
  0x84   :  { %46 = vst [vmem:[#allocation4 + $0x10] sm:$0xff] %v42_v8  ;;  %44 = vst [vmem:[#allocation4] sm:$0xff] %v40_v9 }
  0x85   :  { %v38_v11 = vpop.permute.xlu1 %37  ;;  %v28_v12 = vpop.permute.xlu0 %27 }
  0x86   :  { %v43_v13 = vadd.f32 %v38_v11, %v19_v10  ;;  %v41_v14 = vadd.f32 %v28_v12, %v19_v10 }
  0x88   :  { %47 = vst [vmem:[#allocation4 + $0x18] sm:$0xff] %v43_v13  ;;  %45 = vst [vmem:[#allocation4 + $0x8] sm:$0xff] %v41_v14 }
  0x89   :  { %81 = shalt.err (!%p78_p4)
}
  0x8a   :  { %s82_s2 = scalar_lea.hbm %s151_s3, 512 }
  0x8b   :  { %p83_p5 = scmp.ne.s32.totalorder %s151_s3, %s82_s2  ;;  %p86_p6 = scmp.lt.u32.totalorder %s82_s2, %s151_s3 }
  0x8d   :  { %p88_p7 = pnand %p86_p6, %p83_p5 }
  0x8f   :  { %91 = shalt.err (!%p88_p7)
}
  0x90   :  { %s96_s4 = smov 128   ;;  %s97_s5 = smov 8  }
  0x91   :  { %59 = dma.vmem_to_hbm [thread:$0]  %s54_s22, 512, %s151_s3, [#allocation5], %s96_s4, %s96_s4, %s97_s5  }
  0x92   :  { %92 = dma.done.wait [#allocation5], 512  }
  0x93   :  { %93 = vsyncadd [#allocation5], 4294966784 }
  0x94   :  { %63 = vsyncpa [#allocation5], 1 }

</bundles_post_ra>
